<compile_context>
chip_gen: v6e
topology: v6e:2x2x1
jax: 0.10.0
libtpu: 0.0.40
codegen_flags: <defaults>
</compile_context>

<pallas_src>
import jax
import jax.numpy as jnp
from jax import lax
from jax.experimental import pallas as pl
from jax.experimental.pallas import tpu as pltpu

BN_EPS = 1e-5
_LANE = 128


def _round_up(n, m):
    return (n + m - 1) // m * m


# --------------------------------------------------------------------------
# Kernel
# --------------------------------------------------------------------------
def mlp_kernel(x_ref,
               w1_ref, b1_ref, w2_ref, b2_ref, w3_ref, b3_ref,
               w4_ref, b4_ref,
               o_ref):
    """Fused MLP: 3 x (bf16 MXU matmul -> f32 bias+ReLU -> bf16) -> A·B^T -> sigmoid."""

    def linear_relu_bf16(h_bf16, w_ref, b_ref):
        z = jnp.dot(h_bf16, w_ref[...], preferred_element_type=jnp.float32)
        # bias + ReLU in f32, downcast immediately so the live activation
        # (and any spill traffic) is bf16 rather than f32.
        return jnp.maximum(z + b_ref[...], 0.0).astype(jnp.bfloat16)

    h = x_ref[...].astype(jnp.bfloat16)              # in-kernel bf16 cast of raw x
    h = linear_relu_bf16(h, w1_ref, b1_ref)          # [bb, 256] bf16
    h = linear_relu_bf16(h, w2_ref, b2_ref)          # [bb, 128] bf16
    h = linear_relu_bf16(h, w3_ref, b3_ref)          # [bb, 128] bf16 (64 real + pad)

    # Final Linear(prev, 1): computed as w4 @ h^T so the result is lane-dense
    # along the batch. Only row 0 of w4 is real; rows 1..7 are zero padding.
    logits = lax.dot_general(
        w4_ref[...], h,
        dimension_numbers=(((1,), (1,)), ((), ())),
        preferred_element_type=jnp.float32)          # [8, bb] f32
    o_ref[...] = jax.nn.sigmoid(logits[0:1, :] + b4_ref[...]).astype(o_ref.dtype)


# --------------------------------------------------------------------------
# Parameter folding / padding (one-time, in the wrapper)
# --------------------------------------------------------------------------
def _fold_and_pad_params(params):
    """Fold eval-mode BN into the next Linear; pad OUT dims to 128 lanes; cast bf16.

    Returns [w1, b1, w2, b2, w3, b3, w4_rows, b4]:
      w1       : [F, 256]          bf16  (true K = input_size, no K padding)
      w2, w3   : [in_pad, out_pad] bf16  (BN of the previous block folded in)
      bi       : [1, out_pad]      f32
      w4_rows  : [8, in_pad]       bf16  (row 0 = folded output weights)
      b4       : [1, 1]            f32
    """
    hid = params["hidden"]

    def bn_scale_shift(layer):
        s = layer["gamma"] * lax.rsqrt(layer["var"] + BN_EPS)   # [1, k]
        t = layer["beta"] - layer["mean"] * s                   # [1, k]
        return s, t

    ws = [hid[0]["w"]]
    bs = [hid[0]["b"]]
    for prev, layer in zip(hid[:-1], hid[1:]):
        s, t = bn_scale_shift(prev)
        ws.append(s.reshape(-1, 1) * layer["w"])     # diag(s) @ W
        bs.append(layer["b"] + t @ layer["w"])       # b + t @ W
    s, t = bn_scale_shift(hid[-1])
    w4 = (s.reshape(-1, 1) * params["out"]["w"])[:, 0]          # [k3]
    b4 = params["out"]["b"] + t @ params["out"]["w"]            # [1, 1]

    flat = []
    in_p = ws[0].shape[0]            # first layer keeps its true K (= input_size)
    for w, b in zip(ws, bs):
        kin, kout = w.shape
        kout_p = _round_up(kout, _LANE)
        w_p = jnp.zeros((in_p, kout_p), jnp.float32).at[:kin, :kout].set(w)
        b_p = jnp.zeros((1, kout_p), jnp.float32).at[:, :kout].set(b)
        flat.extend([w_p.astype(jnp.bfloat16), b_p])
        in_p = kout_p                # next layer's K matches the padded lanes

    k3 = w4.shape[0]
    w4_p = jnp.zeros((8, in_p), jnp.float32).at[0, :k3].set(w4)
    flat.extend([w4_p.astype(jnp.bfloat16), b4.astype(jnp.float32)])
    return flat


# --------------------------------------------------------------------------
# Wrapper
# --------------------------------------------------------------------------
def btc_prediction_forward(x, params, *, block_b=None):
    """x: [B, input_size] float32. Returns [B, 1] float32 (sigmoid probs)."""
    B, F = x.shape

    if block_b is None:
        if B <= 256:
            block_b = B              # single exact grid step, no padding at all
        else:
            # >= 2 parallel grid steps (both v7x TensorCores busy); 128-row
            # granularity keeps the [1, block_b] output block lane-dense;
            # 2048-row cap keeps the VMEM footprint ~6-8 MiB.
            block_b = min(_round_up(pl.cdiv(B, 2), _LANE), 2048)

    flat = _fold_and_pad_params(params)

    def param_spec(a):
        # Whole (small, ~170 KB total) parameter array resident in VMEM with a
        # constant block index, so it is fetched once rather than per step.
        return pl.BlockSpec(a.shape, lambda i: (0, 0))

    in_specs = [pl.BlockSpec((block_b, F), lambda i: (i, 0))]   # raw f32 x tiles
    in_specs += [param_spec(a) for a in flat]
    # Lane-dense output: one [1, block_b] row per grid step (partial last
    # block is masked on writeback by Pallas).
    out_specs = pl.BlockSpec((1, block_b), lambda i: (0, i))

    out = pl.pallas_call(
        mlp_kernel,
        out_shape=jax.ShapeDtypeStruct((1, B), jnp.float32),
        grid_spec=pltpu.PrefetchScalarGridSpec(
            num_scalar_prefetch=0,
            grid=(pl.cdiv(B, block_b),),
            in_specs=in_specs,
            out_specs=out_specs,
        ),
        compiler_params=pltpu.CompilerParams(
            dimension_semantics=("parallel",),      # batch tiles shard across TCs
            # Footprint @ block_b=2048: x blocks 2*256 KB + params 2*~170 KB +
            # activation temporaries ~6 MB + out blocks 2*8 KB  << 32 MiB
            # (safe under the v7x scoped-VMEM default).
            vmem_limit_bytes=32 * 1024 * 1024,
        ),
    )(x, *flat)

    return out.reshape(B, 1)


# --------------------------------------------------------------------------
# Synthetic params + pure-JAX reference (unfolded, f32) for checking
# --------------------------------------------------------------------------
def init_params(key, input_size, hidden_sizes=(256, 128, 64)):
    """Deterministic synthetic parameters matching the PyTorch module's shapes.

    Linear weights are stored transposed: [in, out] (PyTorch stores [out, in]).
    BatchNorm params are stored as [1, out] rows.
    """
    params = {"hidden": []}
    prev = input_size
    for h in hidden_sizes:
        key, kw, kb, kg, kbe, km, kv = jax.random.split(key, 7)
        scale = 1.0 / jnp.sqrt(prev)
        params["hidden"].append({
            "w": jax.random.uniform(kw, (prev, h), jnp.float32, -scale, scale),
            "b": jax.random.uniform(kb, (1, h), jnp.float32, -scale, scale),
            "gamma": 1.0 + 0.1 * jax.random.normal(kg, (1, h), jnp.float32),
            "beta": 0.1 * jax.random.normal(kbe, (1, h), jnp.float32),
            "mean": 0.1 * jax.random.normal(km, (1, h), jnp.float32),
            "var": 1.0 + 0.5 * jax.random.uniform(kv, (1, h), jnp.float32),
        })
        prev = h
    key, kw, kb = jax.random.split(key, 3)
    scale = 1.0 / jnp.sqrt(prev)
    params["out"] = {
        "w": jax.random.uniform(kw, (prev, 1), jnp.float32, -scale, scale),
        "b": jax.random.uniform(kb, (1, 1), jnp.float32, -scale, scale),
    }
    return params


def reference_forward(x, params, *, return_logits=False):
    """Pure-JAX reference (eval-mode PyTorch semantics), all f32, unfolded BN."""
    h = x.astype(jnp.float32)
    for layer in params["hidden"]:
        z = h @ layer["w"] + layer["b"]
        z = jnp.maximum(z, 0.0)
        z = (z - layer["mean"]) * lax.rsqrt(layer["var"] + BN_EPS)
        h = z * layer["gamma"] + layer["beta"]
    z = h @ params["out"]["w"] + params["out"]["b"]
    p = jax.nn.sigmoid(z)
    return (p, z) if return_logits else p


if __name__ == "__main__":
    INPUT_SIZE = 32
    HIDDEN = (256, 128, 64)

    key = jax.random.PRNGKey(0)
    key, kx_small, kx_big = jax.random.split(key, 3)
    params = init_params(key, INPUT_SIZE, HIDDEN)

    def check(x):
        out = jax.block_until_ready(btc_prediction_forward(x, params))
        ref_p, ref_z = reference_forward(x, params, return_logits=True)
        assert out.shape == (x.shape[0], 1)
        # bf16 MXU operands (f32 accumulate) -> relaxed tolerance on probabilities.
        err_p = jnp.max(jnp.abs(out - ref_p))
        assert jnp.allclose(out, ref_p, atol=3e-2, rtol=0.0), \
            f"prob mismatch: max abs err = {err_p}"
        # Also compare pre-sigmoid logits (tighter where the sigmoid saturates).
        kz = jnp.log(out) - jnp.log1p(-out)
        err_z = jnp.max(jnp.abs(kz - ref_z))
        assert jnp.allclose(kz, ref_z, atol=1e-1, rtol=0.0), \
            f"logit mismatch: max abs err = {err_z}"

    # Small batch: whole batch in a single exact grid step.
    check(jax.random.normal(kx_small, (16, INPUT_SIZE), jnp.float32))
    # Larger batch: >=2 parallel grid steps + masked partial last block.
    check(jax.random.normal(kx_big, (300, INPUT_SIZE), jnp.float32))

    print("KERNEL_OK")
</pallas_src>

<mosaic_0001>
module attributes {stable_mosaic.version = 11 : i64} {
  func.func @mlp_kernel(%arg0: i32, %arg1: memref<16x32xf32, #tpu.memory_space<vmem>>, %arg2: memref<32x256xbf16, #tpu.memory_space<vmem>>, %arg3: memref<1x256xf32, #tpu.memory_space<vmem>>, %arg4: memref<256x128xbf16, #tpu.memory_space<vmem>>, %arg5: memref<1x128xf32, #tpu.memory_space<vmem>>, %arg6: memref<128x128xbf16, #tpu.memory_space<vmem>>, %arg7: memref<1x128xf32, #tpu.memory_space<vmem>>, %arg8: memref<8x128xbf16, #tpu.memory_space<vmem>>, %arg9: memref<1x1xf32, #tpu.memory_space<vmem>>, %arg10: memref<1x16xf32, #tpu.memory_space<vmem>>) attributes {dimension_semantics = [#tpu.dimension_semantics<parallel>], iteration_bounds = array<i64: 1>, scalar_prefetch = 0 : i64, scratch_operands = 0 : i64, tpu.core_type = #tpu.core_type<tc>, window_params = [{transform_indices = @transform_0, window_bounds = array<i64: 16, 32>}, {pipeline_mode = #tpu.pipeline_mode<synchronous>, transform_indices = @transform_1, window_bounds = array<i64: 32, 256>}, {pipeline_mode = #tpu.pipeline_mode<synchronous>, transform_indices = @transform_2, window_bounds = array<i64: 1, 256>}, {pipeline_mode = #tpu.pipeline_mode<synchronous>, transform_indices = @transform_3, window_bounds = array<i64: 256, 128>}, {pipeline_mode = #tpu.pipeline_mode<synchronous>, transform_indices = @transform_4, window_bounds = array<i64: 1, 128>}, {pipeline_mode = #tpu.pipeline_mode<synchronous>, transform_indices = @transform_5, window_bounds = array<i64: 128, 128>}, {pipeline_mode = #tpu.pipeline_mode<synchronous>, transform_indices = @transform_6, window_bounds = array<i64: 1, 128>}, {pipeline_mode = #tpu.pipeline_mode<synchronous>, transform_indices = @transform_7, window_bounds = array<i64: 8, 128>}, {pipeline_mode = #tpu.pipeline_mode<synchronous>, transform_indices = @transform_8, window_bounds = array<i64: 1, 1>}, {transform_indices = @transform_9, window_bounds = array<i64: 1, 16>}]} {
    %c0 = arith.constant 0 : index
    %c0_0 = arith.constant 0 : index
    %0 = vector.load %arg1[%c0, %c0_0] : memref<16x32xf32, #tpu.memory_space<vmem>>, vector<16x32xf32>
    %1 = arith.truncf %0 : vector<16x32xf32> to vector<16x32xbf16>
    %c0_1 = arith.constant 0 : index
    %c0_2 = arith.constant 0 : index
    %2 = vector.load %arg2[%c0_1, %c0_2] : memref<32x256xbf16, #tpu.memory_space<vmem>>, vector<32x256xbf16>
    %cst = arith.constant dense<0.000000e+00> : vector<16x256xf32>
    %3 = tpu.matmul %1, %2, %cst {dimension_numbers = #tpu.dot_dimension_numbers<[1], [0], [0], [1], [0, 0, 1, 1], [], []>} : vector<16x32xbf16>, vector<32x256xbf16>, vector<16x256xf32> -> vector<16x256xf32>
    %c0_3 = arith.constant 0 : index
    %c0_4 = arith.constant 0 : index
    %4 = vector.load %arg3[%c0_3, %c0_4] : memref<1x256xf32, #tpu.memory_space<vmem>>, vector<1x256xf32>
    %5 = vector.broadcast %4 : vector<1x256xf32> to vector<16x256xf32>
    %6 = arith.addf %3, %5 : vector<16x256xf32>
    %cst_5 = arith.constant 0.000000e+00 : f32
    %7 = vector.broadcast %cst_5 : f32 to vector<16x256xf32>
    %8 = arith.maximumf %6, %7 : vector<16x256xf32>
    %9 = arith.truncf %8 : vector<16x256xf32> to vector<16x256xbf16>
    %c0_6 = arith.constant 0 : index
    %c0_7 = arith.constant 0 : index
    %10 = vector.load %arg4[%c0_6, %c0_7] : memref<256x128xbf16, #tpu.memory_space<vmem>>, vector<256x128xbf16>
    %cst_8 = arith.constant dense<0.000000e+00> : vector<16x128xf32>
    %11 = tpu.matmul %9, %10, %cst_8 {dimension_numbers = #tpu.dot_dimension_numbers<[1], [0], [0], [1], [0, 0, 1, 1], [], []>} : vector<16x256xbf16>, vector<256x128xbf16>, vector<16x128xf32> -> vector<16x128xf32>
    %c0_9 = arith.constant 0 : index
    %c0_10 = arith.constant 0 : index
    %12 = vector.load %arg5[%c0_9, %c0_10] : memref<1x128xf32, #tpu.memory_space<vmem>>, vector<1x128xf32>
    %13 = vector.broadcast %12 : vector<1x128xf32> to vector<16x128xf32>
    %14 = arith.addf %11, %13 : vector<16x128xf32>
    %cst_11 = arith.constant 0.000000e+00 : f32
    %15 = vector.broadcast %cst_11 : f32 to vector<16x128xf32>
    %16 = arith.maximumf %14, %15 : vector<16x128xf32>
    %17 = arith.truncf %16 : vector<16x128xf32> to vector<16x128xbf16>
    %c0_12 = arith.constant 0 : index
    %c0_13 = arith.constant 0 : index
    %18 = vector.load %arg6[%c0_12, %c0_13] : memref<128x128xbf16, #tpu.memory_space<vmem>>, vector<128x128xbf16>
    %cst_14 = arith.constant dense<0.000000e+00> : vector<16x128xf32>
    %19 = tpu.matmul %17, %18, %cst_14 {dimension_numbers = #tpu.dot_dimension_numbers<[1], [0], [0], [1], [0, 0, 1, 1], [], []>} : vector<16x128xbf16>, vector<128x128xbf16>, vector<16x128xf32> -> vector<16x128xf32>
    %c0_15 = arith.constant 0 : index
    %c0_16 = arith.constant 0 : index
    %20 = vector.load %arg7[%c0_15, %c0_16] : memref<1x128xf32, #tpu.memory_space<vmem>>, vector<1x128xf32>
    %21 = vector.broadcast %20 : vector<1x128xf32> to vector<16x128xf32>
    %22 = arith.addf %19, %21 : vector<16x128xf32>
    %cst_17 = arith.constant 0.000000e+00 : f32
    %23 = vector.broadcast %cst_17 : f32 to vector<16x128xf32>
    %24 = arith.maximumf %22, %23 : vector<16x128xf32>
    %25 = arith.truncf %24 : vector<16x128xf32> to vector<16x128xbf16>
    %c0_18 = arith.constant 0 : index
    %c0_19 = arith.constant 0 : index
    %26 = vector.load %arg8[%c0_18, %c0_19] : memref<8x128xbf16, #tpu.memory_space<vmem>>, vector<8x128xbf16>
    %cst_20 = arith.constant dense<0.000000e+00> : vector<8x16xf32>
    %27 = tpu.matmul %26, %25, %cst_20 {dimension_numbers = #tpu.dot_dimension_numbers<[1], [1], [0], [0], [0, 0, 1, 0], [], []>} : vector<8x128xbf16>, vector<16x128xbf16>, vector<8x16xf32> -> vector<8x16xf32>
    %28 = vector.extract_strided_slice %27 {offsets = [0, 0], sizes = [1, 16], strides = [1, 1]} : vector<8x16xf32> to vector<1x16xf32>
    %c0_21 = arith.constant 0 : index
    %c0_22 = arith.constant 0 : index
    %29 = vector.load %arg9[%c0_21, %c0_22] : memref<1x1xf32, #tpu.memory_space<vmem>>, vector<1x1xf32>
    %30 = vector.broadcast %29 : vector<1x1xf32> to vector<1x16xf32>
    %31 = arith.addf %28, %30 : vector<1x16xf32>
    %32 = arith.negf %31 : vector<1x16xf32>
    %33 = math.exp %32 : vector<1x16xf32>
    %cst_23 = arith.constant 1.000000e+00 : f32
    %34 = vector.broadcast %cst_23 : f32 to vector<1x16xf32>
    %35 = arith.addf %34, %33 : vector<1x16xf32>
    %36 = arith.divf %34, %35 : vector<1x16xf32>
    %c0_24 = arith.constant 0 : index
    %c0_25 = arith.constant 0 : index
    %37 = vector.load %arg10[%c0_24, %c0_25] : memref<1x16xf32, #tpu.memory_space<vmem>>, vector<1x16xf32>
    tpu.vector_store %arg10[%c0_24, %c0_25], %36 {strides = array<i32>} : memref<1x16xf32, #tpu.memory_space<vmem>>, vector<1x16xf32>,
    return
  }
  func.func @transform_0(%arg0: i32) -> (i32, i32) {
    %c0_i32 = arith.constant 0 : i32
    %c0_i32_0 = arith.constant 0 : i32
    return %arg0, %c0_i32 : i32, i32
  }
  func.func @transform_1(%arg0: i32) -> (i32, i32) {
    %c0_i32 = arith.constant 0 : i32
    %c0_i32_0 = arith.constant 0 : i32
    %c0_i32_1 = arith.constant 0 : i32
    return %c0_i32, %c0_i32_0 : i32, i32
  }
  func.func @transform_2(%arg0: i32) -> (i32, i32) {
    %c0_i32 = arith.constant 0 : i32
    %c0_i32_0 = arith.constant 0 : i32
    %c0_i32_1 = arith.constant 0 : i32
    return %c0_i32, %c0_i32_0 : i32, i32
  }
  func.func @transform_3(%arg0: i32) -> (i32, i32) {
    %c0_i32 = arith.constant 0 : i32
    %c0_i32_0 = arith.constant 0 : i32
    %c0_i32_1 = arith.constant 0 : i32
    return %c0_i32, %c0_i32_0 : i32, i32
  }
  func.func @transform_4(%arg0: i32) -> (i32, i32) {
    %c0_i32 = arith.constant 0 : i32
    %c0_i32_0 = arith.constant 0 : i32
    %c0_i32_1 = arith.constant 0 : i32
    return %c0_i32, %c0_i32_0 : i32, i32
  }
  func.func @transform_5(%arg0: i32) -> (i32, i32) {
    %c0_i32 = arith.constant 0 : i32
    %c0_i32_0 = arith.constant 0 : i32
    %c0_i32_1 = arith.constant 0 : i32
    return %c0_i32, %c0_i32_0 : i32, i32
  }
  func.func @transform_6(%arg0: i32) -> (i32, i32) {
    %c0_i32 = arith.constant 0 : i32
    %c0_i32_0 = arith.constant 0 : i32
    %c0_i32_1 = arith.constant 0 : i32
    return %c0_i32, %c0_i32_0 : i32, i32
  }
  func.func @transform_7(%arg0: i32) -> (i32, i32) {
    %c0_i32 = arith.constant 0 : i32
    %c0_i32_0 = arith.constant 0 : i32
    %c0_i32_1 = arith.constant 0 : i32
    return %c0_i32, %c0_i32_0 : i32, i32
  }
  func.func @transform_8(%arg0: i32) -> (i32, i32) {
    %c0_i32 = arith.constant 0 : i32
    %c0_i32_0 = arith.constant 0 : i32
    %c0_i32_1 = arith.constant 0 : i32
    return %c0_i32, %c0_i32_0 : i32, i32
  }
  func.func @transform_9(%arg0: i32) -> (i32, i32) {
    %c0_i32 = arith.constant 0 : i32
    %c0_i32_0 = arith.constant 0 : i32
    return %c0_i32, %arg0 : i32, i32
  }
}

</mosaic_0001>

<bundles_post_ra>
// kernel: tpu_custom_call.1
= control target key start
LH: loop header
LB: loop body
LE: loop exit
PB: predicated region body
PF: predicated region fallthrough
CT: control target
= control target key end

     0   :  { %s900_s0 = inlined_call_operand.hbm [shape: f32[16,32], index: 0, kind: input, shape index: {}]   ;;  %s901_s1 = inlined_call_operand.hbm [shape: bf16[32,256], index: 1, kind: input, shape index: {}]   ;;  %s902_s2 = inlined_call_operand.vmem [shape: f32[1,256], index: 2, kind: input, shape index: {}]   ;;  %s903_s3 = inlined_call_operand.hbm [shape: bf16[256,128], index: 3, kind: input, shape index: {}]   ;;  %s904_s4 = inlined_call_operand.vmem [shape: f32[1,128], index: 4, kind: input, shape index: {}]   ;;  %s905_s5 = inlined_call_operand.hbm [shape: bf16[128,128], index: 5, kind: input, shape index: {}]   ;;  %s906_s6 = inlined_call_operand.vmem [shape: f32[1,128], index: 6, kind: input, shape index: {}]   ;;  %s907_s7 = inlined_call_operand.vmem [shape: bf16[8,128], index: 7, kind: input, shape index: {}]   ;;  %s908_s8 = inlined_call_operand.<no memory space> [shape: f32[1,1], index: 8, kind: input, shape index: {}]   ;;  %s909_s9 = inlined_call_operand.hbm [shape: f32[1,16], index: 9, kind: output, shape index: {}]  }
   0x1   :  { %v14_v0 = vstv %s908_s8 }
   0x2   :  { %15 = vst [vmem:[#allocation2] sm:$0x1] %v14_v0 }
   0x3   :  { %16 = vsyncpa [#allocation4], 0 }
   0x4   :  { %17 = vsyncpa [#allocation7], 0 }
   0x5   :  { %18 = vsyncpa [#allocation10], 0 }
   0x6   :  { %19 = vsyncpa [#allocation5], 0  ;;  %s800_s11 = smov [#allocation6]   ;;  %s801_s13 = smov [#allocation3]  }
   0x7   :  { %s37_s12 = sshll.u32 %s800_s11, 4  ;;  %s25_s14 = sshll.u32 %s801_s13, 4  ;;  %s38_s12 = int_to_ptr.vmem [resolvable:$true] %s37_s12  ;;  %s26_s14 = int_to_ptr.vmem [resolvable:$true] %s25_s14 }
   0x8   :  { %s700_s15 = scalar_lea.vmem %s38_s12, 512  ;;  %p705_p1 = scmp.lt.s32.totalorder %s38_s12, %s38_s12 }
   0x9   :  { %p701_p0 = scmp.ne.s32.totalorder %s38_s12, %s700_s15  ;;  %p706_p2 = scmp.lt.s32.totalorder %s700_s15, %s700_s15 }
   0xb   :  { %p707_p3 = por %p706_p2, %p705_p1 }
   0xd   :  { %p708_p4 = pnand %p707_p3, %p701_p0 }
   0xf   :  { %711 = shalt.err (!%p708_p4)
}
  0x10   :  { %s802_s16 = smov 128   ;;  %s803_s8 = smov 8  }
  0x11   :  { %43 = dma.hbm_to_vmem [thread:$0]  %s901_s1, 512, %s38_s12, [#allocation7], %s802_s16, %s802_s16, %s803_s8  }
  0x12   :  { %s720_s19 = scalar_lea.vmem %s26_s14, 256  ;;  %p725_p6 = scmp.lt.s32.totalorder %s26_s14, %s26_s14 }
  0x13   :  { %p721_p5 = scmp.ne.s32.totalorder %s26_s14, %s720_s19  ;;  %p726_p7 = scmp.lt.s32.totalorder %s720_s19, %s720_s19 }
  0x15   :  { %p727_p8 = por %p726_p7, %p725_p6 }
  0x17   :  { %p728_p9 = pnand %p727_p8, %p721_p5 }
  0x19   :  { %731 = shalt.err (!%p728_p9)
}
  0x1a   :  { %31 = dma.hbm_to_vmem [thread:$0]  %s900_s0, 256, %s26_s14, [#allocation4], %s802_s16, %s802_s16, %s803_s8  }
  0x1b   :  { %s804_s22 = smov [#allocation8]  }
  0x1c   :  { %s51_s23 = sshll.u32 %s804_s22, 4  ;;  %s52_s23 = int_to_ptr.vmem [resolvable:$true] %s51_s23 }
  0x1d   :  { %s740_s24 = scalar_lea.vmem %s52_s23, 2048  ;;  %p745_p11 = scmp.lt.s32.totalorder %s52_s23, %s52_s23 }
  0x1e   :  { %p741_p10 = scmp.ne.s32.totalorder %s52_s23, %s740_s24  ;;  %p746_p12 = scmp.lt.s32.totalorder %s740_s24, %s740_s24 }
  0x20   :  { %p747_p13 = por %p746_p12, %p745_p11 }
  0x22   :  { %p748_p0 = pnand %p747_p13, %p741_p10 }
  0x24   :  { %751 = shalt.err (!%p748_p0)
}
  0x25   :  { %s805_s1 = smov 64   ;;  %s806_s25 = smov 4  }
  0x26   :  { %57 = dma.hbm_to_vmem [thread:$0]  %s903_s3, 2048, %s52_s23, [#allocation7], %s805_s1, %s805_s1, %s806_s25  }
  0x27   :  { %s807_s28 = smov [#allocation9]  }
  0x28   :  { %s65_s29 = sshll.u32 %s807_s28, 4  ;;  %s66_s29 = int_to_ptr.vmem [resolvable:$true] %s65_s29 }
  0x29   :  { %s760_s0 = scalar_lea.vmem %s66_s29, 1024  ;;  %p765_p2 = scmp.lt.s32.totalorder %s66_s29, %s66_s29 }
  0x2a   :  { %p761_p1 = scmp.ne.s32.totalorder %s66_s29, %s760_s0  ;;  %p766_p3 = scmp.lt.s32.totalorder %s760_s0, %s760_s0 }
  0x2c   :  { %p767_p4 = por %p766_p3, %p765_p2 }
  0x2e   :  { %p768_p5 = pnand %p767_p4, %p761_p1 }
  0x30   :  { %771 = shalt.err (!%p768_p5)
}
  0x31   :  { %71 = dma.hbm_to_vmem [thread:$0]  %s905_s5, 1024, %s66_s29, [#allocation10], %s805_s1, %s805_s1, %s806_s25  }
  0x32   :  { %792 = dma.done.wait [#allocation4], 256  }
  0x33   :  { %793 = vsyncadd [#allocation4], 4294967040 }
  0x34   :  { %794 = dma.done.wait [#allocation7], 2560  }
  0x35   :  { %795 = vsyncadd [#allocation7], 4294964736 }
  0x36   :  { %796 = dma.done.wait [#allocation10], 1024  }
  0x37   :  { %797 = vsyncadd [#allocation10], 4294966272  ;;  %v808_v1 = vmov 0   ;;  %v658_v2 = vld [vmem:[#allocation6 + $0x14] ss:$8 sps:$4 sm:$0xff]   ;;  %vm130_vm0 = vcmask 261120   ;;  %v100_v30 = vlaneseq }
  0x38   :  { %166 = vmatprep.mubr.bf16.mxu0 %v808_v1  ;;  %657 = vset.pattern.permute.xlu0 %v808_v1  ;;  %v660_v3 = vld [vmem:[#allocation6 + $0x10] ss:$8 sps:$4 sm:$0xff]   ;;  %v661_v4 = vld [vmem:[#allocation6 + $0x4] ss:$8 sps:$4 sm:$0xff]   ;;  %v663_v5 = vld [vmem:[#allocation6] ss:$8 sps:$4 sm:$0xff]  }
  0x39   :  { %146 = vmatprep.subr.bf16.mxu0 %v658_v2  ;;  %v91_v6 = vld [vmem:[#allocation3] sm:$0xff]  ;;  %v92_v7 = vld [vmem:[#allocation3 + $0x8] sm:$0xff]  ;;  %v668_v13 = vld [vmem:[#allocation8 + $0x68] sm:$0xff]   ;;  %v809_v26 = vmov 0.0   ;;  %v877_v31 = vshrl.u32 %v100_v30, 7  ;;  %vm810_vm1 = vmmov 0  }
  0x3a   :  { %147 = vmatpush1.bf16.msra.mxu0 %v660_v3  ;;  %v664_v8 = vld [vmem:[#allocation8 + $0x78] sm:$0xff]   ;;  %v93_v10 = vpack.c.bf16 %v92_v7, %v91_v6  ;;  %v666_v11 = vld [vmem:[#allocation8 + $0x70] sm:$0xff]   ;;  %v669_v14 = vld [vmem:[#allocation8 + $0x28] sm:$0xff]   ;;  %vm535_vm2 = vcmask 122880  }
  0x3b   :  { %148 = vmatprep.subr.bf16.mxu0 %v661_v4  ;;  %v665_v9 = vld [vmem:[#allocation8 + $0x38] sm:$0xff]   ;;  %586 = vmatprep.subr.bf16.mxu1 %v664_v8  ;;  %v667_v12 = vld [vmem:[#allocation8 + $0x30] sm:$0xff]   ;;  %v670_v15 = vld [vmem:[#allocation8 + $0x60] sm:$0xff]   ;;  %v106_v32 = vsub.s32 1, %v877_v31  ;;  %v102_v33 = vsub.s32 0, %v877_v31 }
  0x3c   :  { %587 = vmatpush3.bf16.msra.mxu1 %v665_v9  ;;  %v671_v16 = vld [vmem:[#allocation8 + $0x20] sm:$0xff]   ;;  %v672_v17 = vld [vmem:[#allocation8 + $0x58] sm:$0xff]   ;;  %v674_v19 = vld [vmem:[#allocation8 + $0x50] sm:$0xff]  }
  0x3d   :  { %588 = vmatprep.subr.bf16.mxu1 %v666_v11  ;;  %v673_v18 = vld [vmem:[#allocation8 + $0x18] sm:$0xff]   ;;  %v675_v20 = vld [vmem:[#allocation8 + $0x10] sm:$0xff]   ;;  %v676_v21 = vld [vmem:[#allocation8 + $0x48] sm:$0xff]  }
  0x3e   :  { %149 = vmatpush1.bf16.msra.mxu0 %v663_v5  ;;  %v677_v22 = vld [vmem:[#allocation8 + $0x8] sm:$0xff]   ;;  %v678_v23 = vld [vmem:[#allocation8 + $0x40] sm:$0xff]   ;;  %v680_v25 = vld [vmem:[#allocation9 + $0x38] sm:$0xff]  }
  0x3f   :  { %v679_v24 = vld [vmem:[#allocation8] sm:$0xff]   ;;  %619 = vmatprep.subr.bf16.mxu0 %v809_v26  ;;  %v681_v27 = vld [vmem:[#allocation9 + $0x30] sm:$0xff]   ;;  %v682_v28 = vld [vmem:[#allocation9 + $0x28] sm:$0xff]  }
  0x40   :  { %589 = vmatpush3.bf16.msra.mxu1 %v667_v12  ;;  %v683_v29 = vld [vmem:[#allocation9 + $0x20] sm:$0xff]   ;;  %v98_v34 = vld [vmem:[%s902_s2] sm:$0x3]  ;;  %v684_v51 = vld [vmem:[#allocation9 + $0x18] sm:$0xff]  }
  0x41   :  { %558 = vmatmul.mubr.msk.bf16.vlgmr.msra.gmra.mxu0 %vm130_vm0, %v93_v10  ;;  %590 = vmatprep.subr.bf16.mxu1 %v668_v13  ;;  %v107_v36 = vrot.slane %v98_v34, %v106_v32  ;;  %v103_v37 = vrot.slane %v98_v34, %v102_v33  ;;  %v685_v52 = vld [vmem:[#allocation9 + $0x10] sm:$0xff]   ;;  %v686_v53 = vld [vmem:[#allocation9 + $0x8] sm:$0xff]   ;;  %v687_v54 = vld [vmem:[#allocation9] sm:$0xff]  }
  0x42   :  { %620 = vmatpush3.bf16.msra.mxu0 %v680_v25  ;;  %635 = vmatprep.mubr.msk.bf16.mxu0 %vm810_vm1, %v809_v26  ;;  %v559_v58 = vld [vmem:[%s904_s4] ss:$0 sm:$0xff] }
  0x43   :  { %621 = vmatprep.subr.bf16.mxu0 %v809_v26  ;;  %v518_v3 = vld [vmem:[#allocation2] sm:$0x1] }
  0x44   :  { %591 = vmatpush3.bf16.msra.mxu1 %v669_v14  ;;  %521 = vperm.xlu0 %657, %v518_v3   ;;  %v576_v4 = vld [vmem:[%s906_s6] ss:$0 sm:$0xff]  ;;  %s811_s6 = smov [#allocation11]  }
  0x45   :  { %592 = vmatprep.subr.bf16.mxu1 %v670_v15  ;;  %v477_v14 = vld [vmem:[%s907_s7] sm:$0xf]  ;;  %s543_s15 = sshll.u32 %s811_s6, 4  ;;  %s544_s15 = int_to_ptr.vmem [resolvable:$true] %s543_s15 }
  0x46   :  { %622 = vmatpush3.bf16.msra.mxu0 %v681_v27  ;;  %s772_s7 = scalar_lea.vmem %s544_s15, 16  ;;  %s776_s16 = scalar_lea.vmem %s544_s15, 32 }
  0x47   :  { %623 = vmatprep.subr.bf16.mxu0 %v809_v26  ;;  %p773_p6 = scmp.ne.s32.totalorder %s544_s15, %s772_s7  ;;  %p777_p7 = scmp.lt.s32.totalorder %s544_s15, %s544_s15 }
  0x48   :  { %593 = vmatpush3.bf16.msra.mxu1 %v671_v16  ;;  %p778_p8 = scmp.lt.s32.totalorder %s776_s16, %s772_s7 }
  0x49   :  { %594 = vmatprep.subr.bf16.mxu1 %v672_v17 }
  0x4a   :  { %624 = vmatpush3.bf16.msra.mxu0 %v682_v28  ;;  %p779_p9 = por %p778_p8, %p777_p7 }
  0x4b   :  { %625 = vmatprep.subr.bf16.mxu0 %v809_v26 }
  0x4c   :  { %595 = vmatpush3.bf16.msra.mxu1 %v673_v18  ;;  %p780_p10 = pnand %p779_p9, %p773_p6 }
  0x4d   :  { %596 = vmatprep.subr.bf16.mxu1 %v674_v19 }
  0x4e   :  { %626 = vmatpush3.bf16.msra.mxu0 %v683_v29 }
  0x4f   :  { %627 = vmatprep.subr.bf16.mxu0 %v809_v26 }
  0x50   :  { %597 = vmatpush3.bf16.msra.mxu1 %v675_v20 }
  0x51   :  { %598 = vmatprep.subr.bf16.mxu1 %v676_v21 }
  0x52   :  { %628 = vmatpush3.bf16.msra.mxu0 %v684_v51 }
  0x53   :  { %629 = vmatprep.subr.bf16.mxu0 %v809_v26 }
  0x54   :  { %599 = vmatpush3.bf16.msra.mxu1 %v677_v22 }
  0x55   :  { %600 = vmatprep.subr.bf16.mxu1 %v678_v23 }
  0x56   :  { %630 = vmatpush3.bf16.msra.mxu0 %v685_v52 }
  0x57   :  { %631 = vmatprep.subr.bf16.mxu0 %v809_v26 }
  0x58   :  { %601 = vmatpush3.bf16.msra.mxu1 %v679_v24 }
  0x59   :  { %639 = vmatprep.subr.bf16.mxu1 %v809_v26 }
  0x5a   :  { %632 = vmatpush3.bf16.msra.mxu0 %v686_v53 }
  0x5b   :  { %633 = vmatprep.subr.bf16.mxu0 %v809_v26 }
  0x5e   :  { %634 = vmatpush3.bf16.msra.mxu0 %v687_v54 }
  0xbf   :  { %v522_v15 = vpop.permute.xlu0 %521 }
  0xc0   :  { %v527_v16 = vrot.slane %v522_v15, %v102_v33 }
 0x101   :  { %v168_v35 = vpop.f32.mrf.mxu0 }
 0x102   :  { %v169_v42 = vadd.f32 %v168_v35, %v103_v37 }
 0x103   :  { %v170_v38 = vpop.f32.mrf.mxu0 }
 0x104   :  { %v171_v40 = vadd.f32 %v170_v38, %v107_v36  ;;  %v177_v48 = vmax.f32 %v169_v42, 0.0 }
 0x105   :  { %v172_v39 = vpop.f32.mrf.mxu0 }
 0x106   :  { %v173_v41 = vadd.f32 %v172_v39, %v103_v37  ;;  %v178_v46 = vmax.f32 %v171_v40, 0.0 }
 0x107   :  { %v174_v43 = vpop.f32.mrf.mxu0 }
 0x108   :  { %v175_v44 = vadd.f32 %v174_v43, %v107_v36  ;;  %v179_v45 = vmax.f32 %v173_v41, 0.0 }
 0x10a   :  { %v180_v47 = vmax.f32 %v175_v44, 0.0  ;;  %v181_v50 = vpack.c.bf16 %v179_v45, %v177_v48 }
 0x10c   :  { %v182_v49 = vpack.c.bf16 %v180_v47, %v178_v46 }
 0x10e   :  { %350 = vmatprep.mubr.bf16.mxu1 %v182_v49 }
 0x10f   :  { %351 = vmatmul.mubr.bf16.vlgmr.msra.gmra.mxu1 %v181_v50 }
 0x110   :  { %641 = vmatprep.mubr.msk.bf16.mxu1 %vm810_vm1, %v809_v26 }
 0x1cf   :  { %v602_v55 = vpop.f32.mrf.mxu1 }
 0x1d1   :  { %v603_v56 = vpop.f32.mrf.mxu1 }
 0x1d2   :  { %v604_v57 = vadd.f32 %v603_v56, %v602_v55 }
 0x1d3   :  { %v605_v59 = vpop.f32.mrf.mxu1 }
 0x1d4   :  { %v353_v61 = vadd.f32 %v604_v57, %v559_v58 }
 0x1d5   :  { %v606_v60 = vpop.f32.mrf.mxu1 }
 0x1d6   :  { %v607_v62 = vadd.f32 %v606_v60, %v605_v59  ;;  %v359_v0 = vmax.f32 %v353_v61, 0.0 }
 0x1d8   :  { %v356_v63 = vadd.f32 %v607_v62, %v559_v58 }
 0x1da   :  { %v360_v1 = vmax.f32 %v356_v63, 0.0 }
 0x1dc   :  { %v361_v2 = vpack.c.bf16 %v360_v1, %v359_v0 }
 0x1de   :  { %636 = vmatmul.mubr.bf16.vlgmr.msra.gmra.mxu0 %v361_v2 }
 0x29e   :  { %v467_v5 = vpop.f32.mrf.mxu0 }
 0x29f   :  { %v468_v7 = vadd.f32 %v576_v4, %v467_v5 }
 0x2a0   :  { %v637_v6 = vpop.f32.mrf.mxu0 }
 0x2a1   :  { %v474_v11 = vmax.f32 %v468_v7, 0.0 }
 0x2a2   :  { %v470_v8 = vpop.f32.mrf.mxu0 }
 0x2a3   :  { %v471_v9 = vadd.f32 %v576_v4, %v470_v8 }
 0x2a4   :  { %v638_v10 = vpop.f32.mrf.mxu0 }
 0x2a5   :  { %v475_v12 = vmax.f32 %v471_v9, 0.0 }
 0x2a7   :  { %v476_v13 = vpack.c.bf16 %v475_v12, %v474_v11 }
 0x2a9   :  { %640 = vmatpush3.bf16.xpose.msra.mxu1 %v476_v13 }
 0x2b0   :  { %642 = vmatmul.mubr.bf16.vlgmr.msra.gmra.mxu1 %v477_v14 }
 0x370   :  { %v512_v17 = vpop.f32.mrf.mxu1 }
 0x371   :  { %v528_v18 = vadd.f32 %v527_v16, %v512_v17 }
 0x372   :  { %v643_v19 = vpop.f32.mrf.mxu1 }
 0x373   :  { %v585_v20 = vmul.f32 -1.442695, %v528_v18 }
 0x374   :  { %v515_v21 = vpop.f32.mrf.mxu1 }
 0x375   :  { %688 = vpow2.f32 %v585_v20 }
 0x376   :  { %v644_v22 = vpop.f32.mrf.mxu1 }
 0x382   :  { %v689_v23 = vpop.eup %688 }
 0x383   :  { %v532_v24 = vadd.f32 1.0, %v689_v23 }
 0x385   :  { %690 = vrcp.f32 %v532_v24 }
 0x392   :  { %v691_v25 = vpop.eup %690 }
 0x393   :  { %536 = vst.msk [vmem:[#allocation11] sm:$0x1] %vm535_vm2, %v691_v25 }
 0x394   :  { %783 = shalt.err (!%p780_p10)
}
 0x395   :  { %546 = dma.vmem_to_hbm [thread:$0]  %s544_s15, 16, %s909_s9, [#allocation5]  }
 0x396   :  { %798 = dma.done.wait [#allocation5], 16  }
 0x397   :  { %799 = vsyncadd [#allocation5], 4294967280 }
 0x398   :  { %550 = vsyncpa [#allocation4], 1 }
 0x399   :  { %551 = vsyncpa [#allocation7], 1 }
 0x39a   :  { %552 = vsyncpa [#allocation10], 1 }
 0x39b   :  { %553 = vsyncpa [#allocation5], 1 }

</bundles_post_ra>
